<compile_context>
chip_gen: v7x
topology: tpu7x:2x2x1
jax: 0.10.0
libtpu: 0.0.40
codegen_flags: <defaults>
</compile_context>

<pallas_src>
import math

import jax
import jax.numpy as jnp
from jax.experimental import pallas as pl
from jax.experimental.pallas import tpu as pltpu


# ---------------------------------------------------------------- utilities

def _round_up(n: int, m: int) -> int:
    return ((n + m - 1) // m) * m


def _round_down_clamped(n: int, m: int) -> int:
    # round n down to a multiple of m, but never below m
    return max(m, (n // m) * m)


def _sublane_align(dtype) -> int:
    # sub-32-bit dtypes pack along sublanes: keep row tiles packing-aligned
    itemsize = jnp.dtype(dtype).itemsize
    return {4: 8, 2: 16, 1: 32}.get(itemsize, 8)


def _vmem_budget():
    """(per-x-tile target bytes, scoped vmem limit bytes), generation-aware."""
    cap = None
    try:
        cap = getattr(pltpu.get_tpu_info(), "vmem_capacity_bytes", None)
    except Exception:
        cap = None
    if not cap:
        cap = 64 * 1024 * 1024                      # conservative: v7x per-core VMEM
    # 64 MiB limit on v5e/v6e (128 MiB physical, overrides v5e's 16 MiB default),
    # 48 MiB on v7x (64 MiB physical) -> double-buffered x/out/pe always fits.
    vmem_limit = min(64 * 1024 * 1024, (cap * 3) // 4)
    tile_target = 4 * 1024 * 1024                   # ~4 MiB x tiles: 2x-buf x+out ~= 16 MiB
    return tile_target, vmem_limit


def _select_tiles(batch: int, rows: int, row_bytes: int, sublane: int,
                  tile_target_bytes: int, min_steps: int = 8,
                  min_step_bytes: int = 256 * 1024):
    """Pick (row_tile, batch_tile) for a (batch, rows, lanes) elementwise sweep."""
    budget_rows = max(sublane,
                      ((tile_target_bytes // row_bytes) // sublane) * sublane)

    if rows <= sublane:
        # tiny row extent: use the full dim (always a legal block shape)
        rt = rows
        bt = min(batch, max(1, budget_rows // max(rt, 1)))
        return rt, bt

    rows_pad = _round_up(rows, sublane)
    rt = min(budget_rows, rows_pad)
    # prefer >=2 row blocks: pipelining + v7x megacore sharding of the HBM stream
    if rows_pad >= 2 * sublane:
        rt = min(rt, _round_up(pl.cdiv(rows_pad, 2), sublane))
    bt = min(batch, max(1, budget_rows // rt))

    # enforce a minimum grid-step count for medium/large problems, but never
    # shrink the combined (bt*rt) tile below ~min_step_bytes
    floor_rows = max(sublane, _round_up(pl.cdiv(min_step_bytes, row_bytes), sublane))

    def n_steps(r, b):
        return pl.cdiv(rows, r) * pl.cdiv(batch, b)

    while n_steps(rt, bt) < min_steps:
        if bt > 1 and max(1, bt // 2) * rt >= floor_rows:
            bt = max(1, bt // 2)
        elif rt > sublane and _round_down_clamped(rt // 2, sublane) * bt >= floor_rows:
            rt = _round_down_clamped(rt // 2, sublane)
        else:
            break
    return rt, bt


# ---------------------------------------------------------------- pe buffer

def make_positional_encoding(d_model: int, max_seq_len: int = 5000,
                             dtype=jnp.float32) -> jnp.ndarray:
    """Deterministic pe buffer matching the PyTorch __init__.

    Stored at the activation dtype, with max_seq_len padded so that
    (rows * d_model) is a multiple of 128: the kernel can then view the whole
    buffer lane-dense without any per-call slice/cast XLA ops.
    """
    step = 128 // math.gcd(d_model, 128)
    rows = _round_up(max_seq_len, step)
    position = jnp.arange(0, rows, dtype=jnp.float32)[:, None]                  # (rows, 1)
    div_term = jnp.exp(jnp.arange(0, d_model, 2, dtype=jnp.float32)
                       * (-math.log(10000.0) / d_model))                        # (ceil(D/2),)
    angles = position * div_term                                                # (rows, ceil(D/2))
    pe = jnp.zeros((rows, d_model), jnp.float32)
    pe = pe.at[:, 0::2].set(jnp.sin(angles))
    # NOTE: odd d_model truncates cos to d_model//2 cols (the canonical PyTorch
    # module assumes even d_model and would error there).
    pe = pe.at[:, 1::2].set(jnp.cos(angles)[:, : d_model // 2])
    return pe[None, :, :].astype(dtype)                                         # (1, rows>=L, D)


# ------------------------------------------------------------------- kernel

def _add_pe_kernel(x_ref, pe_ref, o_ref):
    # x_ref/o_ref: (Bt, Rt, lanes) tiles; pe_ref: (Rt, lanes), broadcast over batch
    o_ref[...] = x_ref[...] + pe_ref[...][None, :, :]


def positional_encoding_forward(x: jnp.ndarray, pe: jnp.ndarray,
                                *, donate_x: bool = False) -> jnp.ndarray:
    """x: [B, S, D]; pe: [1, L>=S, D] (from make_positional_encoding)."""
    B, S, D = x.shape
    assert pe.ndim == 3 and pe.shape[0] == 1 and pe.shape[2] == D, "pe/x d_model mismatch"
    L = pe.shape[1]
    assert S <= L, f"seq_len {S} exceeds max_seq_len {L}"

    pe2d = pe[0]                                   # (L, D): metadata-only squeeze
    if pe2d.dtype != x.dtype:
        # TODO(synk): build pe at the activation dtype (make_positional_encoding(dtype=...))
        # so this cast never becomes a separate per-call XLA op / extra HBM pass.
        pe2d = pe2d.astype(x.dtype)

    itemsize = jnp.dtype(x.dtype).itemsize
    sublane = _sublane_align(x.dtype)
    tile_target, vmem_limit = _vmem_budget()
    io_alias = {0: 0} if donate_x else {}

    if (S * D) % 128 == 0:
        # ------------- lane-dense path: view everything as rows of 128 lanes --
        LANES = 128
        R = (S * D) // LANES
        x2 = x.reshape(B, R, LANES)
        if (L * D) % LANES == 0:
            pe2 = pe2d.reshape((L * D) // LANES, LANES)   # free bitcast of the full buffer
        else:
            pe2 = pe2d[:S].reshape(R, LANES)              # user-provided unpadded pe buffer

        Rt, Bt = _select_tiles(B, R, LANES * itemsize, sublane, tile_target)
        if Rt % 8 != 0:
            # tiny R (< one sublane tile): pe block must also be a full-extent block
            pe2 = pe2[:R]

        grid = (pl.cdiv(R, Rt), pl.cdiv(B, Bt))   # batch innermost -> pe tile reused
        out2 = pl.pallas_call(
            _add_pe_kernel,
            out_shape=jax.ShapeDtypeStruct((B, R, LANES), x.dtype),
            grid_spec=pltpu.PrefetchScalarGridSpec(
                num_scalar_prefetch=0,
                grid=grid,
                in_specs=[
                    pl.BlockSpec((Bt, Rt, LANES), lambda r, b: (b, r, 0)),   # x
                    pl.BlockSpec((Rt, LANES),     lambda r, b: (r, 0)),      # pe (batch-invariant)
                ],
                out_specs=pl.BlockSpec((Bt, Rt, LANES), lambda r, b: (b, r, 0)),
            ),
            compiler_params=pltpu.CompilerParams(
                dimension_semantics=("parallel", "parallel"),
                vmem_limit_bytes=vmem_limit),
            input_output_aliases=io_alias,
        )(x2, pe2)
        return out2.reshape(B, S, D)

    # --------------- fallback: S*D not a multiple of 128; tile (batch, seq) ---
    St, Bt = _select_tiles(B, S, D * itemsize, sublane, tile_target)
    if St % 8 != 0:
        pe2d = pe2d[:S]        # tiny S: pe block must also be a full-extent block

    grid = (pl.cdiv(S, St), pl.cdiv(B, Bt))   # batch innermost -> pe tile reused
    return pl.pallas_call(
        _add_pe_kernel,
        out_shape=jax.ShapeDtypeStruct((B, S, D), x.dtype),
        grid_spec=pltpu.PrefetchScalarGridSpec(
            num_scalar_prefetch=0,
            grid=grid,
            in_specs=[
                pl.BlockSpec((Bt, St, D), lambda s, b: (b, s, 0)),   # x
                pl.BlockSpec((St, D),     lambda s, b: (s, 0)),      # pe (batch-invariant)
            ],
            out_specs=pl.BlockSpec((Bt, St, D), lambda s, b: (b, s, 0)),
        ),
        compiler_params=pltpu.CompilerParams(
            dimension_semantics=("parallel", "parallel"),
            vmem_limit_bytes=vmem_limit),
        input_output_aliases=io_alias,
    )(x, pe2d)


if __name__ == "__main__":
    B, S, D = 2, 8, 32
    max_seq_len = 128

    key = jax.random.PRNGKey(0)
    x = jax.random.normal(key, (B, S, D), dtype=jnp.float32)

    pe = make_positional_encoding(D, max_seq_len, dtype=x.dtype)   # deterministic buffer
    out = positional_encoding_forward(x, pe)
    out = jax.block_until_ready(out)

    # sanity check against plain-JAX reference (f32 -> tight tolerance OK)
    ref = x + pe[:, :S, :]
    assert out.shape == (B, S, D)
    assert jnp.allclose(out, ref, atol=1e-6), "mismatch vs reference"

    print("KERNEL_OK")
</pallas_src>

<mosaic_0001>
module attributes {stable_mosaic.version = 11 : i64} {
  func.func @_add_pe_kernel(%arg0: i32, %arg1: i32, %arg2: memref<2x2x128xf32, #tpu.memory_space<vmem>>, %arg3: memref<2x128xf32, #tpu.memory_space<vmem>>, %arg4: memref<2x2x128xf32, #tpu.memory_space<vmem>>) attributes {dimension_semantics = [#tpu.dimension_semantics<parallel>, #tpu.dimension_semantics<parallel>], iteration_bounds = array<i64: 1, 1>, scalar_prefetch = 0 : i64, scratch_operands = 0 : i64, tpu.core_type = #tpu.core_type<tc>, window_params = [{transform_indices = @transform_0, window_bounds = array<i64: 2, 2, 128>}, {transform_indices = @transform_1, window_bounds = array<i64: 2, 128>}, {transform_indices = @transform_2, window_bounds = array<i64: 2, 2, 128>}]} {
    %c0 = arith.constant 0 : index
    %c0_0 = arith.constant 0 : index
    %c0_1 = arith.constant 0 : index
    %0 = vector.load %arg2[%c0, %c0_0, %c0_1] : memref<2x2x128xf32, #tpu.memory_space<vmem>>, vector<2x2x128xf32>
    %c0_2 = arith.constant 0 : index
    %c0_3 = arith.constant 0 : index
    %1 = vector.load %arg3[%c0_2, %c0_3] : memref<2x128xf32, #tpu.memory_space<vmem>>, vector<2x128xf32>
    %2 = vector.shape_cast %1 : vector<2x128xf32> to vector<1x2x128xf32>
    %3 = vector.broadcast %2 : vector<1x2x128xf32> to vector<2x2x128xf32>
    %4 = arith.addf %0, %3 : vector<2x2x128xf32>
    %c0_4 = arith.constant 0 : index
    %c0_5 = arith.constant 0 : index
    %c0_6 = arith.constant 0 : index
    %5 = vector.load %arg4[%c0_4, %c0_5, %c0_6] : memref<2x2x128xf32, #tpu.memory_space<vmem>>, vector<2x2x128xf32>
    tpu.vector_store %arg4[%c0_4, %c0_5, %c0_6], %4 {strides = array<i32>} : memref<2x2x128xf32, #tpu.memory_space<vmem>>, vector<2x2x128xf32>,
    return
  }
  func.func @transform_0(%arg0: i32, %arg1: i32) -> (i32, i32, i32) {
    %c0_i32 = arith.constant 0 : i32
    %c0_i32_0 = arith.constant 0 : i32
    return %arg1, %arg0, %c0_i32 : i32, i32, i32
  }
  func.func @transform_1(%arg0: i32, %arg1: i32) -> (i32, i32) {
    %c0_i32 = arith.constant 0 : i32
    %c0_i32_0 = arith.constant 0 : i32
    return %arg0, %c0_i32 : i32, i32
  }
  func.func @transform_2(%arg0: i32, %arg1: i32) -> (i32, i32, i32) {
    %c0_i32 = arith.constant 0 : i32
    %c0_i32_0 = arith.constant 0 : i32
    return %arg1, %arg0, %c0_i32 : i32, i32, i32
  }
}

</mosaic_0001>

<bundles_post_ra>
// kernel: tpu_custom_call.1
= control target key start
LH: loop header
LB: loop body
LE: loop exit
PB: predicated region body
PF: predicated region fallthrough
CT: control target
= control target key end

     0   :  { %7 = vsyncpa [#allocation3], 0  ;;  %s154_s0 = inlined_call_operand.hbm [shape: f32[2,2,128], index: 0, kind: input, shape index: {}]   ;;  %s155_s1 = inlined_call_operand.vmem [shape: f32[2,128], index: 1, kind: input, shape index: {}]   ;;  %s156_s2 = inlined_call_operand.hbm [shape: f32[2,2,128], index: 2, kind: output, shape index: {}]  }
   0x1   :  { %8 = vsyncpa [#allocation4], 0  ;;  %s102_s9 = smov [#allocation2]   ;;  %s54_s13 = scalar_lea.hbm %s154_s0, 64 }
   0x2   :  { %s14_s10 = sshll.u32 %s102_s9, 4  ;;  %p55_p0 = scmp.ne.s32.totalorder %s154_s0, %s54_s13  ;;  %s15_s10 = int_to_ptr.vmem [resolvable:$true] %s14_s10 }
   0x3   :  { %p58_p1 = scmp.lt.u32.totalorder %s54_s13, %s154_s0 }
   0x5   :  { %p60_p2 = pnand %p58_p1, %p55_p0 }
   0x7   :  { %63 = shalt.err (!%p60_p2)
}
   0x8   :  { %s64_s18 = scalar_lea.vmem %s15_s10, 64  ;;  %p69_p4 = scmp.lt.s32.totalorder %s15_s10, %s15_s10 }
   0x9   :  { %p65_p3 = scmp.ne.s32.totalorder %s15_s10, %s64_s18  ;;  %p70_p5 = scmp.lt.s32.totalorder %s64_s18, %s64_s18 }
   0xb   :  { %p71_p6 = por %p70_p5, %p69_p4 }
   0xd   :  { %p72_p7 = pnand %p71_p6, %p65_p3 }
   0xf   :  { %75 = shalt.err (!%p72_p7)
}
  0x10   :  { %s103_s19 = smov 32   ;;  %s104_s20 = smov 2  }
  0x11   :  { %20 = dma.hbm_to_vmem [thread:$0]  %s154_s0, 64, %s15_s10, [#allocation3], %s103_s19, %s103_s19, %s104_s20  }
  0x12   :  { %98 = dma.done.wait [#allocation3], 64  }
  0x13   :  { %99 = vsyncadd [#allocation3], 4294967232  ;;  %s105_s23 = smov [#allocation5]   ;;  %v26_v0 = vld [vmem:[#allocation2] sm:$0x3] }
  0x14   :  { %s38_s24 = sshll.u32 %s105_s23, 4  ;;  %v28_v1 = vld [vmem:[%s155_s1] sm:$0x3]  ;;  %v27_v2 = vld [vmem:[#allocation2 + $0x2] sm:$0x3]  ;;  %s39_s24 = int_to_ptr.vmem [resolvable:$true] %s38_s24 }
  0x15   :  { %v29_v3 = vadd.f32 %v28_v1, %v26_v0  ;;  %v30_v4 = vadd.f32 %v28_v1, %v27_v2  ;;  %s76_s27 = scalar_lea.vmem %s39_s24, 64  ;;  %p81_p9 = scmp.lt.s32.totalorder %s39_s24, %s39_s24 }
  0x16   :  { %p77_p8 = scmp.ne.s32.totalorder %s39_s24, %s76_s27  ;;  %p82_p10 = scmp.lt.s32.totalorder %s76_s27, %s76_s27 }
  0x17   :  { %31 = vst [vmem:[#allocation5] sm:$0x3] %v29_v3  ;;  %32 = vst [vmem:[#allocation5 + $0x2] sm:$0x3] %v30_v4 }
  0x18   :  { %p83_p11 = por %p82_p10, %p81_p9 }
  0x1a   :  { %p84_p12 = pnand %p83_p11, %p77_p8 }
  0x1c   :  { %87 = shalt.err (!%p84_p12)
}
  0x1d   :  { %s88_s29 = scalar_lea.hbm %s156_s2, 64 }
  0x1e   :  { %p89_p13 = scmp.ne.s32.totalorder %s156_s2, %s88_s29  ;;  %p92_p0 = scmp.lt.u32.totalorder %s88_s29, %s156_s2 }
  0x20   :  { %p94_p1 = pnand %p92_p0, %p89_p13 }
  0x22   :  { %97 = shalt.err (!%p94_p1)
}
  0x23   :  { %44 = dma.vmem_to_hbm [thread:$0]  %s39_s24, 64, %s156_s2, [#allocation4], %s103_s19, %s103_s19, %s104_s20  }
  0x24   :  { %100 = dma.done.wait [#allocation4], 64  }
  0x25   :  { %101 = vsyncadd [#allocation4], 4294967232 }
  0x26   :  { %48 = vsyncpa [#allocation3], 1 }
  0x27   :  { %49 = vsyncpa [#allocation4], 1 }

</bundles_post_ra>
